<compile_context>
chip_gen: v7x
topology: tpu7x:2x2x1
jax: 0.10.0
libtpu: 0.0.40
codegen_flags: <defaults>
</compile_context>

<pallas_src>
from typing import NamedTuple

import jax
import jax.numpy as jnp
from jax.experimental import pallas as pl
from jax.experimental.pallas import tpu as pltpu

HIDDEN = 512    # linear1 out-features (multiple of 128)
IN_FEATS = 784  # linear1 in-features (1*28*28)


def _round_up(x, m):
    return ((x + m - 1) // m) * m


class EncoderDenseParams(NamedTuple):
    w1: jax.Array      # (784, 512)   compute dtype (bf16 by default)
    b1: jax.Array      # (1, 512)     f32
    w2: jax.Array      # (512, L_pad) compute dtype
    b2: jax.Array      # (1, L_pad)   f32
    latent_dims: int   # un-padded L


def prepare_params(w1, b1, w2, b2, compute_dtype=jnp.bfloat16):
    """Cast + pad the weights ONCE (call at init, reuse across forward calls).

    compute_dtype is the MXU operand dtype; accumulation, bias add and ReLU are
    always f32 inside the kernel.
    """
    L = w2.shape[1]
    L_pad = _round_up(L, 128)  # lane-dense output columns -> unmasked vst
    w1_c = w1.astype(compute_dtype)
    w2_c = jnp.pad(w2, ((0, 0), (0, L_pad - L))).astype(compute_dtype)
    b1_c = b1.reshape(1, HIDDEN).astype(jnp.float32)
    b2_c = jnp.pad(b2.reshape(1, L).astype(jnp.float32), ((0, 0), (0, L_pad - L)))
    return EncoderDenseParams(w1_c, b1_c, w2_c, b2_c, L)


def encoder_dense_kernel(x_ref, w1_ref, b1_ref, w2_ref, b2_ref, o_ref):
    # x_ref:  (TB, 784)  caller dtype   w1_ref: (784, 512)  b1_ref: (1, 512)
    # w2_ref: (512, Lp)  b2_ref: (1, Lp)                    o_ref:  (TB, Lp) f32
    # Cast x to the weight dtype in-kernel (no wrapper copy of the activations);
    # both dots accumulate in f32 on the MXU; bias add + ReLU stay in f32 (VPU
    # fast path on all generations, incl. v5e which has no bf16 VPU).
    x = x_ref[...].astype(w1_ref.dtype)
    h = jnp.dot(x, w1_ref[...], preferred_element_type=jnp.float32)
    h = jnp.maximum(h + b1_ref[...], 0.0)
    h = h.astype(w2_ref.dtype)
    y = jnp.dot(h, w2_ref[...], preferred_element_type=jnp.float32) + b2_ref[...]
    o_ref[...] = y.astype(o_ref.dtype)


def encoder_dense(x_nchw, params: EncoderDenseParams, *, tb=512):
    """x_nchw: (B, C, H, W) with C*H*W == 784. Returns (B, latent_dims) f32."""
    B = x_nchw.shape[0]
    x = x_nchw.reshape(B, -1)                     # torch.flatten(x, 1) — view, no copy
    assert x.shape[1] == IN_FEATS, "Encoderdense expects 784 flattened features"
    L = params.latent_dims
    L_pad = params.w2.shape[1]

    # Batch tiling: multiple of 8 sublanes; big tiles amortize per-step overhead.
    tb = _round_up(max(tb, 8), 8)
    B8 = _round_up(B, 8)
    TB = min(tb, B8)
    # v7x megacore: ensure >=2 grid steps whenever the batch allows it so the
    # "parallel" axis is sharded across both TensorCores (no-op on v5e/v6e).
    if B8 // TB < 2 and B8 >= 16:
        TB = _round_up(pl.cdiv(B8, 2), 8)
    B_pad = _round_up(B, TB)
    n_tiles = B_pad // TB
    if B_pad != B:
        # Only pads the final partial batch tile; padded rows are discarded below.
        x = jnp.pad(x, ((0, B_pad - B), (0, 0)))

    bytes_accessed = (
        x.size * x.dtype.itemsize
        + params.w1.size * params.w1.dtype.itemsize
        + params.w2.size * params.w2.dtype.itemsize
        + params.b1.size * 4 + params.b2.size * 4
        + B_pad * L_pad * 4
    )

    out = pl.pallas_call(
        encoder_dense_kernel,
        out_shape=jax.ShapeDtypeStruct((B_pad, L_pad), jnp.float32),
        grid_spec=pltpu.PrefetchScalarGridSpec(
            num_scalar_prefetch=0,
            grid=(n_tiles,),
            in_specs=[
                pl.BlockSpec((TB, IN_FEATS), lambda i: (i, 0)),      # streamed x tile
                pl.BlockSpec((IN_FEATS, HIDDEN), lambda i: (0, 0)),  # W1 VMEM-resident
                pl.BlockSpec((1, HIDDEN), lambda i: (0, 0)),         # b1 resident
                pl.BlockSpec((HIDDEN, L_pad), lambda i: (0, 0)),     # W2 resident
                pl.BlockSpec((1, L_pad), lambda i: (0, 0)),          # b2 resident
            ],
            out_specs=pl.BlockSpec((TB, L_pad), lambda i: (i, 0)),
        ),
        compiler_params=pltpu.CompilerParams(
            dimension_semantics=("parallel",),   # megacore-shard batch on v7x
            vmem_limit_bytes=32 << 20,           # v5e scoped default is only 16 MiB
        ),
        cost_estimate=pl.CostEstimate(
            flops=2 * B_pad * (IN_FEATS * HIDDEN + HIDDEN * L_pad),
            transcendentals=0,
            bytes_accessed=bytes_accessed,
        ),
    )(x, params.w1, params.b1, params.w2, params.b2)

    return out[:B, :L]


def init_params(key, latent_dims):
    """Deterministic nn.Linear-style init: U(-1/sqrt(fan_in), 1/sqrt(fan_in))."""
    k1, k2, k3, k4 = jax.random.split(key, 4)
    s1 = 1.0 / jnp.sqrt(float(IN_FEATS))
    s2 = 1.0 / jnp.sqrt(float(HIDDEN))
    w1 = jax.random.uniform(k1, (IN_FEATS, HIDDEN), jnp.float32, -s1, s1)
    b1 = jax.random.uniform(k2, (HIDDEN,), jnp.float32, -s1, s1)
    w2 = jax.random.uniform(k3, (HIDDEN, latent_dims), jnp.float32, -s2, s2)
    b2 = jax.random.uniform(k4, (latent_dims,), jnp.float32, -s2, s2)
    return w1, b1, w2, b2


if __name__ == "__main__":
    latent_dims = 32
    key = jax.random.PRNGKey(0)
    kx, kp = jax.random.split(key)
    w1, b1, w2, b2 = init_params(kp, latent_dims)

    # Prepare (cast/pad) params ONCE and reuse across calls.
    params_bf16 = prepare_params(w1, b1, w2, b2)                         # default: bf16 operands
    params_f32 = prepare_params(w1, b1, w2, b2, compute_dtype=jnp.float32)

    # --- small MNIST-like input, B=2 (single 8-row tile internally) ---
    B = 2
    x = jax.random.normal(kx, (B, 1, 28, 28), jnp.float32)
    xf = x.reshape(B, -1)
    ref = jnp.maximum(xf @ w1 + b1, 0.0) @ w2 + b2

    out = jax.block_until_ready(encoder_dense(x, params_bf16))
    assert out.shape == (B, latent_dims)
    assert jnp.allclose(out, ref, atol=5e-2, rtol=5e-2)

    # --- exact f32-operand path for tight numeric verification ---
    out_f32 = jax.block_until_ready(encoder_dense(x, params_f32))
    assert jnp.allclose(out_f32, ref, atol=1e-4, rtol=1e-4)

    # --- multi-tile grid path (B not divisible by TB; exercises >=2-tile logic) ---
    B2 = 10
    x2 = jax.random.normal(jax.random.fold_in(kx, 1), (B2, 1, 28, 28), jnp.float32)
    xf2 = x2.reshape(B2, -1)
    ref2 = jnp.maximum(xf2 @ w1 + b1, 0.0) @ w2 + b2
    out2 = jax.block_until_ready(encoder_dense(x2, params_bf16, tb=8))
    assert out2.shape == (B2, latent_dims)
    assert jnp.allclose(out2, ref2, atol=5e-2, rtol=5e-2)

    print("KERNEL_OK")
</pallas_src>

<mosaic_0001>
module attributes {stable_mosaic.version = 11 : i64} {
  func.func @encoder_dense_kernel(%arg0: i32, %arg1: memref<8x784xf32, #tpu.memory_space<vmem>>, %arg2: memref<784x512xbf16, #tpu.memory_space<vmem>>, %arg3: memref<1x512xf32, #tpu.memory_space<vmem>>, %arg4: memref<512x128xbf16, #tpu.memory_space<vmem>>, %arg5: memref<1x128xf32, #tpu.memory_space<vmem>>, %arg6: memref<8x128xf32, #tpu.memory_space<vmem>>) attributes {dimension_semantics = [#tpu.dimension_semantics<parallel>], iteration_bounds = array<i64: 1>, scalar_prefetch = 0 : i64, scratch_operands = 0 : i64, tpu.core_type = #tpu.core_type<tc>, window_params = [{transform_indices = @transform_0, window_bounds = array<i64: 8, 784>}, {pipeline_mode = #tpu.pipeline_mode<synchronous>, transform_indices = @transform_1, window_bounds = array<i64: 784, 512>}, {pipeline_mode = #tpu.pipeline_mode<synchronous>, transform_indices = @transform_2, window_bounds = array<i64: 1, 512>}, {pipeline_mode = #tpu.pipeline_mode<synchronous>, transform_indices = @transform_3, window_bounds = array<i64: 512, 128>}, {pipeline_mode = #tpu.pipeline_mode<synchronous>, transform_indices = @transform_4, window_bounds = array<i64: 1, 128>}, {transform_indices = @transform_5, window_bounds = array<i64: 8, 128>}]} {
    %c0 = arith.constant 0 : index
    %c0_0 = arith.constant 0 : index
    %0 = vector.load %arg1[%c0, %c0_0] : memref<8x784xf32, #tpu.memory_space<vmem>>, vector<8x784xf32>
    %1 = arith.truncf %0 : vector<8x784xf32> to vector<8x784xbf16>
    %c0_1 = arith.constant 0 : index
    %c0_2 = arith.constant 0 : index
    %2 = vector.load %arg2[%c0_1, %c0_2] : memref<784x512xbf16, #tpu.memory_space<vmem>>, vector<784x512xbf16>
    %cst = arith.constant dense<0.000000e+00> : vector<8x512xf32>
    %3 = tpu.matmul %1, %2, %cst {dimension_numbers = #tpu.dot_dimension_numbers<[1], [0], [0], [1], [0, 0, 1, 1], [], []>} : vector<8x784xbf16>, vector<784x512xbf16>, vector<8x512xf32> -> vector<8x512xf32>
    %c0_3 = arith.constant 0 : index
    %c0_4 = arith.constant 0 : index
    %4 = vector.load %arg3[%c0_3, %c0_4] : memref<1x512xf32, #tpu.memory_space<vmem>>, vector<1x512xf32>
    %5 = vector.broadcast %4 : vector<1x512xf32> to vector<8x512xf32>
    %6 = arith.addf %3, %5 : vector<8x512xf32>
    %cst_5 = arith.constant 0.000000e+00 : f32
    %7 = vector.broadcast %cst_5 : f32 to vector<8x512xf32>
    %8 = arith.maximumf %6, %7 : vector<8x512xf32>
    %9 = arith.truncf %8 : vector<8x512xf32> to vector<8x512xbf16>
    %c0_6 = arith.constant 0 : index
    %c0_7 = arith.constant 0 : index
    %10 = vector.load %arg4[%c0_6, %c0_7] : memref<512x128xbf16, #tpu.memory_space<vmem>>, vector<512x128xbf16>
    %cst_8 = arith.constant dense<0.000000e+00> : vector<8x128xf32>
    %11 = tpu.matmul %9, %10, %cst_8 {dimension_numbers = #tpu.dot_dimension_numbers<[1], [0], [0], [1], [0, 0, 1, 1], [], []>} : vector<8x512xbf16>, vector<512x128xbf16>, vector<8x128xf32> -> vector<8x128xf32>
    %c0_9 = arith.constant 0 : index
    %c0_10 = arith.constant 0 : index
    %12 = vector.load %arg5[%c0_9, %c0_10] : memref<1x128xf32, #tpu.memory_space<vmem>>, vector<1x128xf32>
    %13 = vector.broadcast %12 : vector<1x128xf32> to vector<8x128xf32>
    %14 = arith.addf %11, %13 : vector<8x128xf32>
    %c0_11 = arith.constant 0 : index
    %c0_12 = arith.constant 0 : index
    %15 = vector.load %arg6[%c0_11, %c0_12] : memref<8x128xf32, #tpu.memory_space<vmem>>, vector<8x128xf32>
    tpu.vector_store %arg6[%c0_11, %c0_12], %14 {strides = array<i32>} : memref<8x128xf32, #tpu.memory_space<vmem>>, vector<8x128xf32>,
    return
  }
  func.func @transform_0(%arg0: i32) -> (i32, i32) {
    %c0_i32 = arith.constant 0 : i32
    %c0_i32_0 = arith.constant 0 : i32
    return %arg0, %c0_i32 : i32, i32
  }
  func.func @transform_1(%arg0: i32) -> (i32, i32) {
    %c0_i32 = arith.constant 0 : i32
    %c0_i32_0 = arith.constant 0 : i32
    %c0_i32_1 = arith.constant 0 : i32
    return %c0_i32, %c0_i32_0 : i32, i32
  }
  func.func @transform_2(%arg0: i32) -> (i32, i32) {
    %c0_i32 = arith.constant 0 : i32
    %c0_i32_0 = arith.constant 0 : i32
    %c0_i32_1 = arith.constant 0 : i32
    return %c0_i32, %c0_i32_0 : i32, i32
  }
  func.func @transform_3(%arg0: i32) -> (i32, i32) {
    %c0_i32 = arith.constant 0 : i32
    %c0_i32_0 = arith.constant 0 : i32
    %c0_i32_1 = arith.constant 0 : i32
    return %c0_i32, %c0_i32_0 : i32, i32
  }
  func.func @transform_4(%arg0: i32) -> (i32, i32) {
    %c0_i32 = arith.constant 0 : i32
    %c0_i32_0 = arith.constant 0 : i32
    %c0_i32_1 = arith.constant 0 : i32
    return %c0_i32, %c0_i32_0 : i32, i32
  }
  func.func @transform_5(%arg0: i32) -> (i32, i32) {
    %c0_i32 = arith.constant 0 : i32
    %c0_i32_0 = arith.constant 0 : i32
    return %arg0, %c0_i32 : i32, i32
  }
}

</mosaic_0001>

<bundles_post_ra>
// kernel: tpu_custom_call.1
= control target key start
LH: loop header
LB: loop body
LE: loop exit
PB: predicated region body
PF: predicated region fallthrough
CT: control target
= control target key end

     0   :  { %10 = vsyncpa [#allocation3], 0  ;;  %s2798_s0 = inlined_call_operand.hbm [shape: f32[8,784], index: 0, kind: input, shape index: {}]   ;;  %s2799_s1 = inlined_call_operand.hbm [shape: bf16[784,512], index: 1, kind: input, shape index: {}]   ;;  %s2800_s2 = inlined_call_operand.vmem [shape: f32[1,512], index: 2, kind: input, shape index: {}]   ;;  %s2801_s3 = inlined_call_operand.hbm [shape: bf16[512,128], index: 3, kind: input, shape index: {}]   ;;  %s2802_s4 = inlined_call_operand.vmem [shape: f32[1,128], index: 4, kind: input, shape index: {}]   ;;  %s2803_s5 = inlined_call_operand.hbm [shape: f32[8,128], index: 5, kind: output, shape index: {}]  }
   0x1   :  { %11 = vsyncpa [#allocation6], 0 }
   0x2   :  { %12 = vsyncpa [#allocation4], 0  ;;  %s2705_s18 = smov [#allocation5]   ;;  %s2611_s22 = scalar_lea.hbm %s2799_s1, 25088 }
   0x3   :  { %s28_s19 = sshll.u32 %s2705_s18, 4  ;;  %p2612_p0 = scmp.ne.s32.totalorder %s2799_s1, %s2611_s22  ;;  %s29_s19 = int_to_ptr.vmem [resolvable:$true] %s28_s19 }
   0x4   :  { %p2615_p1 = scmp.lt.u32.totalorder %s2611_s22, %s2799_s1 }
   0x6   :  { %p2617_p2 = pnand %p2615_p1, %p2612_p0 }
   0x8   :  { %2620 = shalt.err (!%p2617_p2)
}
   0x9   :  { %s2621_s27 = scalar_lea.vmem %s29_s19, 25088  ;;  %p2626_p4 = scmp.lt.s32.totalorder %s29_s19, %s29_s19 }
   0xa   :  { %p2622_p3 = scmp.ne.s32.totalorder %s29_s19, %s2621_s27  ;;  %p2627_p5 = scmp.lt.s32.totalorder %s2621_s27, %s2621_s27 }
   0xc   :  { %p2628_p6 = por %p2627_p5, %p2626_p4 }
   0xe   :  { %p2629_p7 = pnand %p2628_p6, %p2622_p3 }
  0x10   :  { %2632 = shalt.err (!%p2629_p7)
}
  0x11   :  { %s2706_s28 = smov 256   ;;  %s2707_s29 = smov 16  }
  0x12   :  { %34 = dma.hbm_to_vmem [thread:$0]  %s2799_s1, 25088, %s29_s19, [#allocation6], %s2706_s28, %s2706_s28, %s2707_s29  }
  0x13   :  { %s2708_s7 = smov [#allocation2]   ;;  %s2709_s9 = smov [#allocation7]  }
  0x14   :  { %s19_s8 = sshll.u32 %s2708_s7, 4  ;;  %s42_s10 = sshll.u32 %s2709_s9, 4  ;;  %s20_s8 = int_to_ptr.vmem [resolvable:$true] %s19_s8  ;;  %s43_s10 = int_to_ptr.vmem [resolvable:$true] %s42_s10 }
  0x15   :  { %s2633_s13 = scalar_lea.hbm %s2798_s0, 896 }
  0x16   :  { %p2634_p8 = scmp.ne.s32.totalorder %s2798_s0, %s2633_s13  ;;  %p2637_p9 = scmp.lt.u32.totalorder %s2633_s13, %s2798_s0 }
  0x18   :  { %p2639_p10 = pnand %p2637_p9, %p2634_p8 }
  0x1a   :  { %2642 = shalt.err (!%p2639_p10)
}
  0x1b   :  { %s2643_s1 = scalar_lea.vmem %s20_s8, 896  ;;  %p2648_p12 = scmp.lt.s32.totalorder %s20_s8, %s20_s8 }
  0x1c   :  { %p2644_p11 = scmp.ne.s32.totalorder %s20_s8, %s2643_s1  ;;  %p2649_p13 = scmp.lt.s32.totalorder %s2643_s1, %s2643_s1 }
  0x1e   :  { %p2650_p0 = por %p2649_p13, %p2648_p12 }
  0x20   :  { %p2651_p1 = pnand %p2650_p0, %p2644_p11 }
  0x22   :  { %2654 = shalt.err (!%p2651_p1)
}
  0x23   :  { %22 = dma.hbm_to_vmem [thread:$0]  %s2798_s0, 896, %s20_s8, [#allocation3]  }
  0x24   :  { %s2655_s22 = scalar_lea.hbm %s2801_s3, 4096 }
  0x25   :  { %p2656_p2 = scmp.ne.s32.totalorder %s2801_s3, %s2655_s22  ;;  %p2659_p3 = scmp.lt.u32.totalorder %s2655_s22, %s2801_s3 }
  0x27   :  { %p2661_p4 = pnand %p2659_p3, %p2656_p2 }
  0x29   :  { %2664 = shalt.err (!%p2661_p4)
}
  0x2a   :  { %s2665_s27 = scalar_lea.vmem %s43_s10, 4096  ;;  %p2670_p6 = scmp.lt.s32.totalorder %s43_s10, %s43_s10 }
  0x2b   :  { %p2666_p5 = scmp.ne.s32.totalorder %s43_s10, %s2665_s27  ;;  %p2671_p7 = scmp.lt.s32.totalorder %s2665_s27, %s2665_s27 }
  0x2d   :  { %p2672_p8 = por %p2671_p7, %p2670_p6 }
  0x2f   :  { %p2673_p9 = pnand %p2672_p8, %p2666_p5 }
  0x31   :  { %2676 = shalt.err (!%p2673_p9)
}
  0x32   :  { %s2710_s0 = smov 64   ;;  %s2711_s28 = smov 4  }
  0x33   :  { %48 = dma.hbm_to_vmem [thread:$0]  %s2801_s3, 4096, %s43_s10, [#allocation6], %s2710_s0, %s2710_s0, %s2711_s28  }
  0x34   :  { %2699 = dma.done.wait [#allocation3], 896  }
  0x35   :  { %2700 = vsyncadd [#allocation3], 4294966400 }
  0x36   :  { %2701 = dma.done.wait [#allocation6], 29184  }
  0x37   :  { %2702 = vsyncadd [#allocation6], 4294938112  ;;  %v2285_v0 = vld [vmem:[#allocation5 + $0x4] ss:$16 sps:$4 sm:$0xff]   ;;  %v2287_v1 = vld [vmem:[#allocation5 + $0xc] ss:$16 sps:$4 sm:$0xff]  }
  0x38   :  { %1277 = vmatprep.subr.bf16.mxu0 %v2285_v0  ;;  %v2289_v2 = vld [vmem:[#allocation5] ss:$16 sps:$4 sm:$0xff]   ;;  %v2290_v3 = vld [vmem:[#allocation5 + $0x8] ss:$16 sps:$4 sm:$0xff]   ;;  %1441 = vmatprep.subr.bf16.mxu1 %v2287_v1  ;;  %v2291_v4 = vld [vmem:[#allocation5 + $0x24] ss:$16 sps:$4 sm:$0xff]  }
  0x39   :  { %1278 = vmatpush1.bf16.msra.mxu0 %v2289_v2  ;;  %1442 = vmatpush1.bf16.msra.mxu1 %v2290_v3  ;;  %v2293_v5 = vld [vmem:[#allocation5 + $0x2c] ss:$16 sps:$4 sm:$0xff]   ;;  %v2295_v6 = vld [vmem:[#allocation5 + $0x20] ss:$16 sps:$4 sm:$0xff]   ;;  %v2296_v7 = vld [vmem:[#allocation5 + $0x28] ss:$16 sps:$4 sm:$0xff]  }
  0x3a   :  { %1279 = vmatprep.subr.bf16.mxu0 %v2291_v4  ;;  %1443 = vmatprep.subr.bf16.mxu1 %v2293_v5  ;;  %v2297_v8 = vld [vmem:[#allocation5 + $0x44] ss:$16 sps:$4 sm:$0xff]   ;;  %v2299_v9 = vld [vmem:[#allocation5 + $0x4c] ss:$16 sps:$4 sm:$0xff]   ;;  %v2301_v10 = vld [vmem:[#allocation5 + $0x40] ss:$16 sps:$4 sm:$0xff]  }
  0x3b   :  { %v2302_v11 = vld [vmem:[#allocation5 + $0x48] ss:$16 sps:$4 sm:$0xff]   ;;  %v2303_v12 = vld [vmem:[#allocation5 + $0x64] ss:$16 sps:$4 sm:$0xff]   ;;  %v2305_v13 = vld [vmem:[#allocation5 + $0x6c] ss:$16 sps:$4 sm:$0xff]  }
  0x3c   :  { %v2307_v14 = vld [vmem:[#allocation5 + $0x60] ss:$16 sps:$4 sm:$0xff]   ;;  %v2308_v15 = vld [vmem:[#allocation5 + $0x68] ss:$16 sps:$4 sm:$0xff]   ;;  %v2309_v16 = vld [vmem:[#allocation5 + $0x84] ss:$16 sps:$4 sm:$0xff]  }
  0x3d   :  { %1280 = vmatpush1.bf16.msra.mxu0 %v2295_v6  ;;  %1444 = vmatpush1.bf16.msra.mxu1 %v2296_v7  ;;  %v2311_v17 = vld [vmem:[#allocation5 + $0x8c] ss:$16 sps:$4 sm:$0xff]   ;;  %v2313_v18 = vld [vmem:[#allocation5 + $0x80] ss:$16 sps:$4 sm:$0xff]   ;;  %v2314_v19 = vld [vmem:[#allocation5 + $0x88] ss:$16 sps:$4 sm:$0xff]  }
  0x3e   :  { %1281 = vmatprep.subr.bf16.mxu0 %v2297_v8  ;;  %1445 = vmatprep.subr.bf16.mxu1 %v2299_v9  ;;  %v2315_v20 = vld [vmem:[#allocation5 + $0xa4] ss:$16 sps:$4 sm:$0xff]   ;;  %v2317_v21 = vld [vmem:[#allocation5 + $0xac] ss:$16 sps:$4 sm:$0xff]   ;;  %v2319_v22 = vld [vmem:[#allocation5 + $0xa0] ss:$16 sps:$4 sm:$0xff]  }
  0x3f   :  { %v2320_v23 = vld [vmem:[#allocation5 + $0xa8] ss:$16 sps:$4 sm:$0xff]   ;;  %v2321_v24 = vld [vmem:[#allocation5 + $0xc4] ss:$16 sps:$4 sm:$0xff]   ;;  %v2323_v25 = vld [vmem:[#allocation5 + $0xcc] ss:$16 sps:$4 sm:$0xff]  }
  0x40   :  { %v2325_v26 = vld [vmem:[#allocation5 + $0xc0] ss:$16 sps:$4 sm:$0xff]   ;;  %v2326_v27 = vld [vmem:[#allocation5 + $0xc8] ss:$16 sps:$4 sm:$0xff]   ;;  %v2327_v28 = vld [vmem:[#allocation5 + $0xe4] ss:$16 sps:$4 sm:$0xff]  }
  0x41   :  { %1282 = vmatpush1.bf16.msra.mxu0 %v2301_v10  ;;  %1446 = vmatpush1.bf16.msra.mxu1 %v2302_v11  ;;  %v2329_v29 = vld [vmem:[#allocation5 + $0xec] ss:$16 sps:$4 sm:$0xff]   ;;  %v2331_v30 = vld [vmem:[#allocation5 + $0xe0] ss:$16 sps:$4 sm:$0xff]   ;;  %v2332_v31 = vld [vmem:[#allocation5 + $0xe8] ss:$16 sps:$4 sm:$0xff]  }
  0x42   :  { %1283 = vmatprep.subr.bf16.mxu0 %v2303_v12  ;;  %1447 = vmatprep.subr.bf16.mxu1 %v2305_v13  ;;  %v2333_v32 = vld [vmem:[#allocation5 + $0x104] ss:$16 sps:$4 sm:$0xff]   ;;  %v2335_v33 = vld [vmem:[#allocation5 + $0x10c] ss:$16 sps:$4 sm:$0xff]   ;;  %v2337_v34 = vld [vmem:[#allocation5 + $0x100] ss:$16 sps:$4 sm:$0xff]  }
  0x43   :  { %v2338_v35 = vld [vmem:[#allocation5 + $0x108] ss:$16 sps:$4 sm:$0xff]   ;;  %v2339_v36 = vld [vmem:[#allocation5 + $0x124] ss:$16 sps:$4 sm:$0xff]   ;;  %v2341_v37 = vld [vmem:[#allocation5 + $0x12c] ss:$16 sps:$4 sm:$0xff]  }
  0x44   :  { %v2343_v38 = vld [vmem:[#allocation5 + $0x120] ss:$16 sps:$4 sm:$0xff]   ;;  %v2344_v39 = vld [vmem:[#allocation5 + $0x128] ss:$16 sps:$4 sm:$0xff]   ;;  %v2345_v40 = vld [vmem:[#allocation5 + $0x144] ss:$16 sps:$4 sm:$0xff]  }
  0x45   :  { %1284 = vmatpush1.bf16.msra.mxu0 %v2307_v14  ;;  %1448 = vmatpush1.bf16.msra.mxu1 %v2308_v15  ;;  %v2347_v41 = vld [vmem:[#allocation5 + $0x14c] ss:$16 sps:$4 sm:$0xff]   ;;  %v2349_v42 = vld [vmem:[#allocation5 + $0x140] ss:$16 sps:$4 sm:$0xff]   ;;  %v2350_v43 = vld [vmem:[#allocation5 + $0x148] ss:$16 sps:$4 sm:$0xff]  }
  0x46   :  { %1285 = vmatprep.subr.bf16.mxu0 %v2309_v16  ;;  %1449 = vmatprep.subr.bf16.mxu1 %v2311_v17  ;;  %v2351_v44 = vld [vmem:[#allocation5 + $0x164] ss:$16 sps:$4 sm:$0xff]   ;;  %v2353_v45 = vld [vmem:[#allocation5 + $0x16c] ss:$16 sps:$4 sm:$0xff]   ;;  %v2355_v47 = vld [vmem:[#allocation5 + $0x160] ss:$16 sps:$4 sm:$0xff]  }
  0x47   :  { %v62_v46 = vld [vmem:[#allocation2 + $0x8] sm:$0xff]  ;;  %v2356_v49 = vld [vmem:[#allocation5 + $0x168] ss:$16 sps:$4 sm:$0xff]   ;;  %v2359_v51 = vld [vmem:[#allocation5 + $0x18c] ss:$16 sps:$4 sm:$0xff]   ;;  %vm1273_vm0 = vcmask 130048  }
  0x48   :  { %v69_v48 = vpack.c.bf16 %v62_v46, %v62_v46  ;;  %v2357_v50 = vld [vmem:[#allocation5 + $0x184] ss:$16 sps:$4 sm:$0xff]   ;;  %v2361_v52 = vld [vmem:[#allocation5 + $0x180] ss:$16 sps:$4 sm:$0xff]   ;;  %v2362_v53 = vld [vmem:[#allocation5 + $0x188] ss:$16 sps:$4 sm:$0xff]  }
  0x49   :  { %1286 = vmatpush1.bf16.msra.mxu0 %v2313_v18  ;;  %1450 = vmatpush1.bf16.msra.mxu1 %v2314_v19  ;;  %v2363_v54 = vld [vmem:[#allocation5 + $0x1a4] ss:$16 sps:$4 sm:$0xff]   ;;  %v2365_v55 = vld [vmem:[#allocation5 + $0x1ac] ss:$16 sps:$4 sm:$0xff]   ;;  %v2367_v56 = vld [vmem:[#allocation5 + $0x1a0] ss:$16 sps:$4 sm:$0xff]  }
  0x4a   :  { %1287 = vmatprep.subr.bf16.mxu0 %v2315_v20  ;;  %1451 = vmatprep.subr.bf16.mxu1 %v2317_v21  ;;  %v2368_v57 = vld [vmem:[#allocation5 + $0x1a8] ss:$16 sps:$4 sm:$0xff]   ;;  %v2369_v58 = vld [vmem:[#allocation5 + $0x1c4] ss:$16 sps:$4 sm:$0xff]   ;;  %v2371_v59 = vld [vmem:[#allocation5 + $0x1cc] ss:$16 sps:$4 sm:$0xff]  }
  0x4b   :  { %1309 = vmatprep.mubr.bf16.mxu0 %v69_v48  ;;  %1473 = vmatprep.mubr.bf16.mxu1 %v69_v48  ;;  %v2373_v60 = vld [vmem:[#allocation5 + $0x1c0] ss:$16 sps:$4 sm:$0xff]   ;;  %v2374_v61 = vld [vmem:[#allocation5 + $0x1c8] ss:$16 sps:$4 sm:$0xff]   ;;  %v2375_v62 = vld [vmem:[#allocation5 + $0x1e4] ss:$16 sps:$4 sm:$0xff]  }
  0x4c   :  { %v2377_v63 = vld [vmem:[#allocation5 + $0x1ec] ss:$16 sps:$4 sm:$0xff]   ;;  %v2379_v0 = vld [vmem:[#allocation5 + $0x1e0] ss:$16 sps:$4 sm:$0xff]   ;;  %v2380_v1 = vld [vmem:[#allocation5 + $0x1e8] ss:$16 sps:$4 sm:$0xff]  }
  0x4d   :  { %1288 = vmatpush1.bf16.msra.mxu0 %v2319_v22  ;;  %1452 = vmatpush1.bf16.msra.mxu1 %v2320_v23  ;;  %v61_v2 = vld [vmem:[#allocation2] sm:$0xff]  ;;  %v2383_v3 = vld [vmem:[#allocation5 + $0x204] ss:$16 sps:$4 sm:$0xff]   ;;  %v2381_v6 = vld [vmem:[#allocation5 + $0x200] ss:$16 sps:$4 sm:$0xff]   ;;  %s2713_s8 = smov [#allocation8]  }
  0x4e   :  { %1289 = vmatprep.subr.bf16.mxu0 %v2321_v24  ;;  %1453 = vmatprep.subr.bf16.mxu1 %v2323_v25  ;;  %v2386_v4 = vld [vmem:[#allocation5 + $0x20c] ss:$16 sps:$4 sm:$0xff]   ;;  %v68_v5 = vpack.c.bf16 %v61_v2, %v61_v2  ;;  %v2384_v7 = vld [vmem:[#allocation5 + $0x208] ss:$16 sps:$4 sm:$0xff]   ;;  %v2389_v8 = vld [vmem:[#allocation5 + $0x224] ss:$16 sps:$4 sm:$0xff]  }
  0x4f   :  { %v2392_v9 = vld [vmem:[#allocation5 + $0x22c] ss:$16 sps:$4 sm:$0xff]   ;;  %v2387_v10 = vld [vmem:[#allocation5 + $0x220] ss:$16 sps:$4 sm:$0xff]   ;;  %v2390_v11 = vld [vmem:[#allocation5 + $0x228] ss:$16 sps:$4 sm:$0xff]  }
  0x50   :  { %v2395_v12 = vld [vmem:[#allocation5 + $0x244] ss:$16 sps:$4 sm:$0xff]   ;;  %v2398_v13 = vld [vmem:[#allocation5 + $0x24c] ss:$16 sps:$4 sm:$0xff]   ;;  %v2393_v14 = vld [vmem:[#allocation5 + $0x240] ss:$16 sps:$4 sm:$0xff]  }
  0x51   :  { %1290 = vmatpush1.bf16.msra.mxu0 %v2325_v26  ;;  %1454 = vmatpush1.bf16.msra.mxu1 %v2326_v27  ;;  %v2396_v15 = vld [vmem:[#allocation5 + $0x248] ss:$16 sps:$4 sm:$0xff]   ;;  %v2401_v16 = vld [vmem:[#allocation5 + $0x264] ss:$16 sps:$4 sm:$0xff]   ;;  %v2404_v17 = vld [vmem:[#allocation5 + $0x26c] ss:$16 sps:$4 sm:$0xff]  }
  0x52   :  { %1291 = vmatprep.subr.bf16.mxu0 %v2327_v28  ;;  %1455 = vmatprep.subr.bf16.mxu1 %v2329_v29  ;;  %v2399_v18 = vld [vmem:[#allocation5 + $0x260] ss:$16 sps:$4 sm:$0xff]   ;;  %v2402_v19 = vld [vmem:[#allocation5 + $0x268] ss:$16 sps:$4 sm:$0xff]   ;;  %v2407_v20 = vld [vmem:[#allocation5 + $0x284] ss:$16 sps:$4 sm:$0xff]  }
  0x53   :  { %v2410_v21 = vld [vmem:[#allocation5 + $0x28c] ss:$16 sps:$4 sm:$0xff]   ;;  %v2405_v22 = vld [vmem:[#allocation5 + $0x280] ss:$16 sps:$4 sm:$0xff]   ;;  %v2408_v23 = vld [vmem:[#allocation5 + $0x288] ss:$16 sps:$4 sm:$0xff]  }
  0x54   :  { %v2413_v24 = vld [vmem:[#allocation5 + $0x2a4] ss:$16 sps:$4 sm:$0xff]   ;;  %v2416_v25 = vld [vmem:[#allocation5 + $0x2ac] ss:$16 sps:$4 sm:$0xff]   ;;  %v2411_v26 = vld [vmem:[#allocation5 + $0x2a0] ss:$16 sps:$4 sm:$0xff]  }
  0x55   :  { %1292 = vmatpush1.bf16.msra.mxu0 %v2331_v30  ;;  %1456 = vmatpush1.bf16.msra.mxu1 %v2332_v31  ;;  %v2414_v27 = vld [vmem:[#allocation5 + $0x2a8] ss:$16 sps:$4 sm:$0xff]   ;;  %v2419_v28 = vld [vmem:[#allocation5 + $0x2c4] ss:$16 sps:$4 sm:$0xff]   ;;  %v2422_v29 = vld [vmem:[#allocation5 + $0x2cc] ss:$16 sps:$4 sm:$0xff]  }
  0x56   :  { %1293 = vmatprep.subr.bf16.mxu0 %v2333_v32  ;;  %1457 = vmatprep.subr.bf16.mxu1 %v2335_v33  ;;  %v64_v30 = vld [vmem:[#allocation2 + $0x18] sm:$0xff]  ;;  %v2420_v33 = vld [vmem:[#allocation5 + $0x2c8] ss:$16 sps:$4 sm:$0xff]   ;;  %s1963_s9 = sshll.u32 %s2713_s8, 4  ;;  %s1964_s9 = int_to_ptr.vmem [resolvable:$true] %s1963_s9 }
  0x57   :  { %v2417_v31 = vld [vmem:[#allocation5 + $0x2c0] ss:$16 sps:$4 sm:$0xff]   ;;  %v71_v32 = vpack.c.bf16 %v64_v30, %v64_v30  ;;  %v2443_v46 = vld [vmem:[#allocation5 + $0x344] ss:$16 sps:$4 sm:$0xff]   ;;  %s2677_s10 = scalar_lea.vmem %s1964_s9, 128  ;;  %p2682_p11 = scmp.lt.s32.totalorder %s1964_s9, %s1964_s9 }
  0x58   :  { %v2441_v48 = vld [vmem:[#allocation5 + $0x340] ss:$16 sps:$4 sm:$0xff]   ;;  %v2473_v2 = vld [vmem:[#allocation5 + $0x3e4] ss:$16 sps:$4 sm:$0xff]   ;;  %p2678_p10 = scmp.ne.s32.totalorder %s1964_s9, %s2677_s10  ;;  %p2683_p12 = scmp.lt.s32.totalorder %s2677_s10, %s2677_s10 }
  0x59   :  { %1294 = vmatpush1.bf16.msra.mxu0 %v2337_v34  ;;  %1458 = vmatpush1.bf16.msra.mxu1 %v2338_v35  ;;  %v2425_v34 = vld [vmem:[#allocation5 + $0x2e4] ss:$16 sps:$4 sm:$0xff]   ;;  %v2428_v35 = vld [vmem:[#allocation5 + $0x2ec] ss:$16 sps:$4 sm:$0xff]  }
  0x5a   :  { %1295 = vmatprep.subr.bf16.mxu0 %v2339_v36  ;;  %1459 = vmatprep.subr.bf16.mxu1 %v2341_v37  ;;  %v2423_v36 = vld [vmem:[#allocation5 + $0x2e0] ss:$16 sps:$4 sm:$0xff]   ;;  %v2426_v37 = vld [vmem:[#allocation5 + $0x2e8] ss:$16 sps:$4 sm:$0xff]   ;;  %v2509_v30 = vld [vmem:[#allocation5 + $0x4a4] ss:$16 sps:$4 sm:$0xff]   ;;  %p2684_p13 = por %p2683_p12, %p2682_p11 }
  0x5c   :  { %p2685_p0 = pnand %p2684_p13, %p2678_p10 }
  0x5d   :  { %1296 = vmatpush1.bf16.msra.mxu0 %v2343_v38  ;;  %1460 = vmatpush1.bf16.msra.mxu1 %v2344_v39  ;;  %v2431_v38 = vld [vmem:[#allocation5 + $0x304] ss:$16 sps:$4 sm:$0xff]   ;;  %v2434_v39 = vld [vmem:[#allocation5 + $0x30c] ss:$16 sps:$4 sm:$0xff]  }
  0x5e   :  { %1297 = vmatprep.subr.bf16.mxu0 %v2345_v40  ;;  %1461 = vmatprep.subr.bf16.mxu1 %v2347_v41  ;;  %v2429_v40 = vld [vmem:[#allocation5 + $0x300] ss:$16 sps:$4 sm:$0xff]   ;;  %v2432_v41 = vld [vmem:[#allocation5 + $0x308] ss:$16 sps:$4 sm:$0xff]  }
  0x61   :  { %1298 = vmatpush1.bf16.msra.mxu0 %v2349_v42  ;;  %1462 = vmatpush1.bf16.msra.mxu1 %v2350_v43  ;;  %v2437_v42 = vld [vmem:[#allocation5 + $0x324] ss:$16 sps:$4 sm:$0xff]   ;;  %v2440_v43 = vld [vmem:[#allocation5 + $0x32c] ss:$16 sps:$4 sm:$0xff]  }
  0x62   :  { %1299 = vmatprep.subr.bf16.mxu0 %v2351_v44  ;;  %1463 = vmatprep.subr.bf16.mxu1 %v2353_v45  ;;  %v2435_v44 = vld [vmem:[#allocation5 + $0x320] ss:$16 sps:$4 sm:$0xff]   ;;  %v2438_v45 = vld [vmem:[#allocation5 + $0x328] ss:$16 sps:$4 sm:$0xff]  }
  0x65   :  { %1300 = vmatpush1.bf16.msra.mxu0 %v2355_v47  ;;  %1464 = vmatpush1.bf16.msra.mxu1 %v2356_v49  ;;  %v2446_v47 = vld [vmem:[#allocation5 + $0x34c] ss:$16 sps:$4 sm:$0xff]   ;;  %v2444_v49 = vld [vmem:[#allocation5 + $0x348] ss:$16 sps:$4 sm:$0xff]  }
  0x66   :  { %1301 = vmatprep.subr.bf16.mxu0 %v2357_v50  ;;  %1465 = vmatprep.subr.bf16.mxu1 %v2359_v51  ;;  %v2449_v50 = vld [vmem:[#allocation5 + $0x364] ss:$16 sps:$4 sm:$0xff]   ;;  %v2452_v51 = vld [vmem:[#allocation5 + $0x36c] ss:$16 sps:$4 sm:$0xff]  }
  0x69   :  { %1302 = vmatpush1.bf16.msra.mxu0 %v2361_v52  ;;  %1466 = vmatpush1.bf16.msra.mxu1 %v2362_v53  ;;  %v2447_v52 = vld [vmem:[#allocation5 + $0x360] ss:$16 sps:$4 sm:$0xff]   ;;  %v2450_v53 = vld [vmem:[#allocation5 + $0x368] ss:$16 sps:$4 sm:$0xff]  }
  0x6a   :  { %1303 = vmatprep.subr.bf16.mxu0 %v2363_v54  ;;  %1467 = vmatprep.subr.bf16.mxu1 %v2365_v55  ;;  %v2455_v54 = vld [vmem:[#allocation5 + $0x384] ss:$16 sps:$4 sm:$0xff]   ;;  %v2458_v55 = vld [vmem:[#allocation5 + $0x38c] ss:$16 sps:$4 sm:$0xff]  }
  0x6d   :  { %1304 = vmatpush1.bf16.msra.mxu0 %v2367_v56  ;;  %1468 = vmatpush1.bf16.msra.mxu1 %v2368_v57  ;;  %v2453_v56 = vld [vmem:[#allocation5 + $0x380] ss:$16 sps:$4 sm:$0xff]   ;;  %v2456_v57 = vld [vmem:[#allocation5 + $0x388] ss:$16 sps:$4 sm:$0xff]  }
  0x6e   :  { %1305 = vmatprep.subr.bf16.mxu0 %v2369_v58  ;;  %1469 = vmatprep.subr.bf16.mxu1 %v2371_v59  ;;  %v2461_v58 = vld [vmem:[#allocation5 + $0x3a4] ss:$16 sps:$4 sm:$0xff]   ;;  %v2464_v59 = vld [vmem:[#allocation5 + $0x3ac] ss:$16 sps:$4 sm:$0xff]  }
  0x71   :  { %1306 = vmatpush1.bf16.msra.mxu0 %v2373_v60  ;;  %1470 = vmatpush1.bf16.msra.mxu1 %v2374_v61  ;;  %v2459_v60 = vld [vmem:[#allocation5 + $0x3a0] ss:$16 sps:$4 sm:$0xff]   ;;  %v2462_v61 = vld [vmem:[#allocation5 + $0x3a8] ss:$16 sps:$4 sm:$0xff]  }
  0x72   :  { %1307 = vmatprep.subr.bf16.mxu0 %v2375_v62  ;;  %1471 = vmatprep.subr.bf16.mxu1 %v2377_v63  ;;  %v2467_v62 = vld [vmem:[#allocation5 + $0x3c4] ss:$16 sps:$4 sm:$0xff]   ;;  %v2470_v63 = vld [vmem:[#allocation5 + $0x3cc] ss:$16 sps:$4 sm:$0xff]  }
  0x75   :  { %1308 = vmatpush1.bf16.msra.mxu0 %v2379_v0  ;;  %1472 = vmatpush1.bf16.msra.mxu1 %v2380_v1  ;;  %v2465_v0 = vld [vmem:[#allocation5 + $0x3c0] ss:$16 sps:$4 sm:$0xff]   ;;  %v2468_v1 = vld [vmem:[#allocation5 + $0x3c8] ss:$16 sps:$4 sm:$0xff]  }
  0x76   :  { %1318 = vmatprep.subr.bf16.mxu0 %v2383_v3  ;;  %1482 = vmatprep.subr.bf16.mxu1 %v2386_v4  ;;  %v2476_v3 = vld [vmem:[#allocation5 + $0x3ec] ss:$16 sps:$4 sm:$0xff]   ;;  %v2471_v4 = vld [vmem:[#allocation5 + $0x3e0] ss:$16 sps:$4 sm:$0xff]  }
  0x78   :  { %1310 = vmatmul.mubr.bf16.vlgmr.msra.gmra.mrb[0].mxu0 %v68_v5  ;;  %1474 = vmatmul.mubr.bf16.vlgmr.msra.gmra.mrb[0].mxu1 %v68_v5  ;;  %v2474_v5 = vld [vmem:[#allocation5 + $0x3e8] ss:$16 sps:$4 sm:$0xff]  }
  0x79   :  { %1319 = vmatpush1.bf16.msra.mxu0 %v2381_v6  ;;  %1483 = vmatpush1.bf16.msra.mxu1 %v2384_v7  ;;  %v2479_v6 = vld [vmem:[#allocation5 + $0x404] ss:$16 sps:$4 sm:$0xff]   ;;  %v63_v7 = vld [vmem:[#allocation2 + $0x10] sm:$0xff] }
  0x7a   :  { %1320 = vmatprep.subr.bf16.mxu0 %v2389_v8  ;;  %1484 = vmatprep.subr.bf16.mxu1 %v2392_v9  ;;  %v2482_v8 = vld [vmem:[#allocation5 + $0x40c] ss:$16 sps:$4 sm:$0xff]   ;;  %v2477_v9 = vld [vmem:[#allocation5 + $0x400] ss:$16 sps:$4 sm:$0xff]  }
  0x7b   :  { %1350 = vmatprep.mubr.bf16.mxu0 %v71_v32  ;;  %1514 = vmatprep.mubr.bf16.mxu1 %v71_v32  ;;  %v2507_v32 = vld [vmem:[#allocation5 + $0x4a0] ss:$16 sps:$4 sm:$0xff]  }
  0x7d   :  { %1321 = vmatpush1.bf16.msra.mxu0 %v2387_v10  ;;  %1485 = vmatpush1.bf16.msra.mxu1 %v2390_v11  ;;  %v70_v10 = vpack.c.bf16 %v63_v7, %v63_v7  ;;  %v2480_v11 = vld [vmem:[#allocation5 + $0x408] ss:$16 sps:$4 sm:$0xff]   ;;  %v2572_v7 = vld [vmem:[#allocation5 + $0x5ec] ss:$16 sps:$4 sm:$0xff]  }
  0x7e   :  { %1322 = vmatprep.subr.bf16.mxu0 %v2395_v12  ;;  %1486 = vmatprep.subr.bf16.mxu1 %v2398_v13  ;;  %v2485_v12 = vld [vmem:[#allocation5 + $0x424] ss:$16 sps:$4 sm:$0xff]   ;;  %v2488_v13 = vld [vmem:[#allocation5 + $0x42c] ss:$16 sps:$4 sm:$0xff]  }
  0x81   :  { %1323 = vmatpush1.bf16.msra.mxu0 %v2393_v14  ;;  %1487 = vmatpush1.bf16.msra.mxu1 %v2396_v15  ;;  %v66_v14 = vld [vmem:[#allocation2 + $0x28] sm:$0xff] }
  0x82   :  { %1324 = vmatprep.subr.bf16.mxu0 %v2401_v16  ;;  %1488 = vmatprep.subr.bf16.mxu1 %v2404_v17  ;;  %v73_v15 = vpack.c.bf16 %v66_v14, %v66_v14  ;;  %v2483_v16 = vld [vmem:[#allocation5 + $0x420] ss:$16 sps:$4 sm:$0xff]   ;;  %v2486_v17 = vld [vmem:[#allocation5 + $0x428] ss:$16 sps:$4 sm:$0xff]  }
  0x83   :  { %v2573_v14 = vld [vmem:[#allocation5 + $0x600] ss:$16 sps:$4 sm:$0xff]  }
  0x85   :  { %1325 = vmatpush1.bf16.msra.mxu0 %v2399_v18  ;;  %1489 = vmatpush1.bf16.msra.mxu1 %v2402_v19  ;;  %v2491_v18 = vld [vmem:[#allocation5 + $0x444] ss:$16 sps:$4 sm:$0xff]   ;;  %v2494_v19 = vld [vmem:[#allocation5 + $0x44c] ss:$16 sps:$4 sm:$0xff]  }
  0x86   :  { %1326 = vmatprep.subr.bf16.mxu0 %v2407_v20  ;;  %1490 = vmatprep.subr.bf16.mxu1 %v2410_v21  ;;  %v2489_v20 = vld [vmem:[#allocation5 + $0x440] ss:$16 sps:$4 sm:$0xff]   ;;  %v2492_v21 = vld [vmem:[#allocation5 + $0x448] ss:$16 sps:$4 sm:$0xff]  }
  0x89   :  { %1327 = vmatpush1.bf16.msra.mxu0 %v2405_v22  ;;  %1491 = vmatpush1.bf16.msra.mxu1 %v2408_v23  ;;  %v2497_v22 = vld [vmem:[#allocation5 + $0x464] ss:$16 sps:$4 sm:$0xff]   ;;  %v2500_v23 = vld [vmem:[#allocation5 + $0x46c] ss:$16 sps:$4 sm:$0xff]  }
  0x8a   :  { %1328 = vmatprep.subr.bf16.mxu0 %v2413_v24  ;;  %1492 = vmatprep.subr.bf16.mxu1 %v2416_v25  ;;  %v2495_v24 = vld [vmem:[#allocation5 + $0x460] ss:$16 sps:$4 sm:$0xff]   ;;  %v2498_v25 = vld [vmem:[#allocation5 + $0x468] ss:$16 sps:$4 sm:$0xff]  }
  0x8d   :  { %1329 = vmatpush1.bf16.msra.mxu0 %v2411_v26  ;;  %1493 = vmatpush1.bf16.msra.mxu1 %v2414_v27  ;;  %v2503_v26 = vld [vmem:[#allocation5 + $0x484] ss:$16 sps:$4 sm:$0xff]   ;;  %v2506_v27 = vld [vmem:[#allocation5 + $0x48c] ss:$16 sps:$4 sm:$0xff]  }
  0x8e   :  { %1330 = vmatprep.subr.bf16.mxu0 %v2419_v28  ;;  %1494 = vmatprep.subr.bf16.mxu1 %v2422_v29  ;;  %v2501_v28 = vld [vmem:[#allocation5 + $0x480] ss:$16 sps:$4 sm:$0xff]   ;;  %v2504_v29 = vld [vmem:[#allocation5 + $0x488] ss:$16 sps:$4 sm:$0xff]  }
  0x91   :  { %1331 = vmatpush1.bf16.msra.mxu0 %v2417_v31  ;;  %1495 = vmatpush1.bf16.msra.mxu1 %v2420_v33  ;;  %v2512_v31 = vld [vmem:[#allocation5 + $0x4ac] ss:$16 sps:$4 sm:$0xff]   ;;  %v2510_v33 = vld [vmem:[#allocation5 + $0x4a8] ss:$16 sps:$4 sm:$0xff]  }
  0x92   :  { %1332 = vmatprep.subr.bf16.mxu0 %v2425_v34  ;;  %1496 = vmatprep.subr.bf16.mxu1 %v2428_v35  ;;  %v2515_v34 = vld [vmem:[#allocation5 + $0x4c4] ss:$16 sps:$4 sm:$0xff]   ;;  %v2518_v35 = vld [vmem:[#allocation5 + $0x4cc] ss:$16 sps:$4 sm:$0xff]  }
  0x95   :  { %1333 = vmatpush1.bf16.msra.mxu0 %v2423_v36  ;;  %1497 = vmatpush1.bf16.msra.mxu1 %v2426_v37  ;;  %v2513_v36 = vld [vmem:[#allocation5 + $0x4c0] ss:$16 sps:$4 sm:$0xff]   ;;  %v2516_v37 = vld [vmem:[#allocation5 + $0x4c8] ss:$16 sps:$4 sm:$0xff]  }
  0x96   :  { %1334 = vmatprep.subr.bf16.mxu0 %v2431_v38  ;;  %1498 = vmatprep.subr.bf16.mxu1 %v2434_v39  ;;  %v2521_v38 = vld [vmem:[#allocation5 + $0x4e4] ss:$16 sps:$4 sm:$0xff]   ;;  %v2524_v39 = vld [vmem:[#allocation5 + $0x4ec] ss:$16 sps:$4 sm:$0xff]  }
  0x99   :  { %1335 = vmatpush1.bf16.msra.mxu0 %v2429_v40  ;;  %1499 = vmatpush1.bf16.msra.mxu1 %v2432_v41  ;;  %v2519_v40 = vld [vmem:[#allocation5 + $0x4e0] ss:$16 sps:$4 sm:$0xff]   ;;  %v2522_v41 = vld [vmem:[#allocation5 + $0x4e8] ss:$16 sps:$4 sm:$0xff]  }
  0x9a   :  { %1336 = vmatprep.subr.bf16.mxu0 %v2437_v42  ;;  %1500 = vmatprep.subr.bf16.mxu1 %v2440_v43  ;;  %v2527_v42 = vld [vmem:[#allocation5 + $0x504] ss:$16 sps:$4 sm:$0xff]   ;;  %v2530_v43 = vld [vmem:[#allocation5 + $0x50c] ss:$16 sps:$4 sm:$0xff]  }
  0x9d   :  { %1337 = vmatpush1.bf16.msra.mxu0 %v2435_v44  ;;  %1501 = vmatpush1.bf16.msra.mxu1 %v2438_v45  ;;  %v2525_v44 = vld [vmem:[#allocation5 + $0x500] ss:$16 sps:$4 sm:$0xff]   ;;  %v2528_v45 = vld [vmem:[#allocation5 + $0x508] ss:$16 sps:$4 sm:$0xff]  }
  0x9e   :  { %1338 = vmatprep.subr.bf16.mxu0 %v2443_v46  ;;  %1502 = vmatprep.subr.bf16.mxu1 %v2446_v47  ;;  %v2533_v46 = vld [vmem:[#allocation5 + $0x524] ss:$16 sps:$4 sm:$0xff]   ;;  %v2536_v47 = vld [vmem:[#allocation5 + $0x52c] ss:$16 sps:$4 sm:$0xff]  }
  0xa1   :  { %1339 = vmatpush1.bf16.msra.mxu0 %v2441_v48  ;;  %1503 = vmatpush1.bf16.msra.mxu1 %v2444_v49  ;;  %v2531_v48 = vld [vmem:[#allocation5 + $0x520] ss:$16 sps:$4 sm:$0xff]   ;;  %v2534_v49 = vld [vmem:[#allocation5 + $0x528] ss:$16 sps:$4 sm:$0xff]  }
  0xa2   :  { %1340 = vmatprep.subr.bf16.mxu0 %v2449_v50  ;;  %1504 = vmatprep.subr.bf16.mxu1 %v2452_v51  ;;  %v2539_v50 = vld [vmem:[#allocation5 + $0x544] ss:$16 sps:$4 sm:$0xff]   ;;  %v2542_v51 = vld [vmem:[#allocation5 + $0x54c] ss:$16 sps:$4 sm:$0xff]  }
  0xa5   :  { %1341 = vmatpush1.bf16.msra.mxu0 %v2447_v52  ;;  %1505 = vmatpush1.bf16.msra.mxu1 %v2450_v53  ;;  %v2537_v52 = vld [vmem:[#allocation5 + $0x540] ss:$16 sps:$4 sm:$0xff]   ;;  %v2540_v53 = vld [vmem:[#allocation5 + $0x548] ss:$16 sps:$4 sm:$0xff]  }
  0xa6   :  { %1342 = vmatprep.subr.bf16.mxu0 %v2455_v54  ;;  %1506 = vmatprep.subr.bf16.mxu1 %v2458_v55  ;;  %v2545_v54 = vld [vmem:[#allocation5 + $0x564] ss:$16 sps:$4 sm:$0xff]   ;;  %v2548_v55 = vld [vmem:[#allocation5 + $0x56c] ss:$16 sps:$4 sm:$0xff]  }
  0xa9   :  { %1343 = vmatpush1.bf16.msra.mxu0 %v2453_v56  ;;  %1507 = vmatpush1.bf16.msra.mxu1 %v2456_v57  ;;  %v2543_v56 = vld [vmem:[#allocation5 + $0x560] ss:$16 sps:$4 sm:$0xff]   ;;  %v2546_v57 = vld [vmem:[#allocation5 + $0x568] ss:$16 sps:$4 sm:$0xff]  }
  0xaa   :  { %1344 = vmatprep.subr.bf16.mxu0 %v2461_v58  ;;  %1508 = vmatprep.subr.bf16.mxu1 %v2464_v59  ;;  %v2551_v58 = vld [vmem:[#allocation5 + $0x584] ss:$16 sps:$4 sm:$0xff]   ;;  %v2554_v59 = vld [vmem:[#allocation5 + $0x58c] ss:$16 sps:$4 sm:$0xff]  }
  0xad   :  { %1345 = vmatpush1.bf16.msra.mxu0 %v2459_v60  ;;  %1509 = vmatpush1.bf16.msra.mxu1 %v2462_v61  ;;  %v2549_v60 = vld [vmem:[#allocation5 + $0x580] ss:$16 sps:$4 sm:$0xff]   ;;  %v2552_v61 = vld [vmem:[#allocation5 + $0x588] ss:$16 sps:$4 sm:$0xff]  }
  0xae   :  { %1346 = vmatprep.subr.bf16.mxu0 %v2467_v62  ;;  %1510 = vmatprep.subr.bf16.mxu1 %v2470_v63  ;;  %v2557_v62 = vld [vmem:[#allocation5 + $0x5a4] ss:$16 sps:$4 sm:$0xff]   ;;  %v2560_v63 = vld [vmem:[#allocation5 + $0x5ac] ss:$16 sps:$4 sm:$0xff]  }
  0xb1   :  { %1347 = vmatpush1.bf16.msra.mxu0 %v2465_v0  ;;  %1511 = vmatpush1.bf16.msra.mxu1 %v2468_v1  ;;  %v2555_v0 = vld [vmem:[#allocation5 + $0x5a0] ss:$16 sps:$4 sm:$0xff]   ;;  %v2558_v1 = vld [vmem:[#allocation5 + $0x5a8] ss:$16 sps:$4 sm:$0xff]  }
  0xb2   :  { %1348 = vmatprep.subr.bf16.mxu0 %v2473_v2  ;;  %1512 = vmatprep.subr.bf16.mxu1 %v2476_v3  ;;  %v2563_v2 = vld [vmem:[#allocation5 + $0x5c4] ss:$16 sps:$4 sm:$0xff]   ;;  %v2566_v3 = vld [vmem:[#allocation5 + $0x5cc] ss:$16 sps:$4 sm:$0xff]  }
  0xb5   :  { %1349 = vmatpush1.bf16.msra.mxu0 %v2471_v4  ;;  %1513 = vmatpush1.bf16.msra.mxu1 %v2474_v5  ;;  %v2561_v4 = vld [vmem:[#allocation5 + $0x5c0] ss:$16 sps:$4 sm:$0xff]   ;;  %v2564_v5 = vld [vmem:[#allocation5 + $0x5c8] ss:$16 sps:$4 sm:$0xff]  }
  0xb6   :  { %1359 = vmatprep.subr.bf16.mxu0 %v2479_v6  ;;  %1523 = vmatprep.subr.bf16.mxu1 %v2482_v8  ;;  %v2569_v6 = vld [vmem:[#allocation5 + $0x5e4] ss:$16 sps:$4 sm:$0xff]   ;;  %v2567_v8 = vld [vmem:[#allocation5 + $0x5e0] ss:$16 sps:$4 sm:$0xff]  }
  0xb8   :  { %1351 = vmatmul.mubr.bf16.vlgmr.msra.gmra.mrb[0].mxu0 %v70_v10  ;;  %1515 = vmatmul.mubr.bf16.vlgmr.msra.gmra.mrb[0].mxu1 %v70_v10  ;;  %v65_v10 = vld [vmem:[#allocation2 + $0x20] sm:$0xff] }
  0xb9   :  { %1360 = vmatpush1.bf16.msra.mxu0 %v2477_v9  ;;  %1524 = vmatpush1.bf16.msra.mxu1 %v2480_v11  ;;  %v2570_v9 = vld [vmem:[#allocation5 + $0x5e8] ss:$16 sps:$4 sm:$0xff]   ;;  %v2575_v11 = vld [vmem:[#allocation5 + $0x604] ss:$16 sps:$4 sm:$0xff]  }
  0xba   :  { %1361 = vmatprep.subr.bf16.mxu0 %v2485_v12  ;;  %1525 = vmatprep.subr.bf16.mxu1 %v2488_v13  ;;  %v2578_v12 = vld [vmem:[#allocation5 + $0x60c] ss:$16 sps:$4 sm:$0xff]   ;;  %v72_v13 = vpack.c.bf16 %v65_v10, %v65_v10 }
  0xbb   :  { %1391 = vmatprep.mubr.bf16.mxu0 %v73_v15  ;;  %1555 = vmatprep.mubr.bf16.mxu1 %v73_v15  ;;  %v2576_v15 = vld [vmem:[#allocation5 + $0x608] ss:$16 sps:$4 sm:$0xff]  }
  0xbd   :  { %1362 = vmatpush1.bf16.msra.mxu0 %v2483_v16  ;;  %1526 = vmatpush1.bf16.msra.mxu1 %v2486_v17  ;;  %v2579_v16 = vld [vmem:[#allocation7 + $0x40] sm:$0xff]  }
  0xbe   :  { %1363 = vmatprep.subr.bf16.mxu0 %v2491_v18  ;;  %1527 = vmatprep.subr.bf16.mxu1 %v2494_v19  ;;  %v2580_v17 = vld [vmem:[#allocation7 + $0xc0] sm:$0xff]   ;;  %v2712_v18 = vmov 0   ;;  %v67_v19 = vld [vmem:[#allocation2 + $0x30] sm:$0xff] }
  0xc1   :  { %1364 = vmatpush1.bf16.msra.mxu0 %v2489_v20  ;;  %1528 = vmatpush1.bf16.msra.mxu1 %v2492_v21  ;;  %v74_v20 = vpack.c.bf16 %v67_v19, %v67_v19  ;;  %v2581_v21 = vld [vmem:[#allocation7] sm:$0xff]  }
  0xc2   :  { %1365 = vmatprep.subr.bf16.mxu0 %v2497_v22  ;;  %1529 = vmatprep.subr.bf16.mxu1 %v2500_v23  ;;  %v2582_v22 = vld [vmem:[#allocation7 + $0x80] sm:$0xff]   ;;  %v2583_v23 = vld [vmem:[#allocation7 + $0x48] sm:$0xff]  }
  0xc5   :  { %1366 = vmatpush1.bf16.msra.mxu0 %v2495_v24  ;;  %1530 = vmatpush1.bf16.msra.mxu1 %v2498_v25  ;;  %v2584_v24 = vld [vmem:[#allocation7 + $0xc8] sm:$0xff]  }
  0xc6   :  { %1367 = vmatprep.subr.bf16.mxu0 %v2503_v26  ;;  %1531 = vmatprep.subr.bf16.mxu1 %v2506_v27  ;;  %v2585_v25 = vld [vmem:[#allocation7 + $0x8] sm:$0xff]   ;;  %v2587_v27 = vld [vmem:[#allocation7 + $0x50] sm:$0xff]  }
  0xc7   :  { %v2586_v26 = vld [vmem:[#allocation7 + $0x88] sm:$0xff]  }
  0xc9   :  { %1368 = vmatpush1.bf16.msra.mxu0 %v2501_v28  ;;  %1532 = vmatpush1.bf16.msra.mxu1 %v2504_v29  ;;  %v2588_v28 = vld [vmem:[#allocation7 + $0xd0] sm:$0xff]  }
  0xca   :  { %1369 = vmatprep.subr.bf16.mxu0 %v2509_v30  ;;  %1533 = vmatprep.subr.bf16.mxu1 %v2512_v31  ;;  %v2589_v29 = vld [vmem:[#allocation7 + $0x10] sm:$0xff]   ;;  %v2591_v31 = vld [vmem:[#allocation7 + $0x58] sm:$0xff]  }
  0xcb   :  { %v2590_v30 = vld [vmem:[#allocation7 + $0x90] sm:$0xff]  }
  0xcd   :  { %1370 = vmatpush1.bf16.msra.mxu0 %v2507_v32  ;;  %1534 = vmatpush1.bf16.msra.mxu1 %v2510_v33  ;;  %v2592_v32 = vld [vmem:[#allocation7 + $0xd8] sm:$0xff]  }
  0xce   :  { %1371 = vmatprep.subr.bf16.mxu0 %v2515_v34  ;;  %1535 = vmatprep.subr.bf16.mxu1 %v2518_v35  ;;  %v2593_v33 = vld [vmem:[#allocation7 + $0x18] sm:$0xff]   ;;  %v2595_v35 = vld [vmem:[#allocation7 + $0x60] sm:$0xff]  }
  0xcf   :  { %v2594_v34 = vld [vmem:[#allocation7 + $0x98] sm:$0xff]  }
  0xd1   :  { %1372 = vmatpush1.bf16.msra.mxu0 %v2513_v36  ;;  %1536 = vmatpush1.bf16.msra.mxu1 %v2516_v37  ;;  %v2596_v36 = vld [vmem:[#allocation7 + $0xe0] sm:$0xff]  }
  0xd2   :  { %1373 = vmatprep.subr.bf16.mxu0 %v2521_v38  ;;  %1537 = vmatprep.subr.bf16.mxu1 %v2524_v39  ;;  %v2597_v37 = vld [vmem:[#allocation7 + $0x20] sm:$0xff]   ;;  %v2599_v39 = vld [vmem:[#allocation7 + $0x68] sm:$0xff]  }
  0xd3   :  { %v2598_v38 = vld [vmem:[#allocation7 + $0xa0] sm:$0xff]  }
  0xd5   :  { %1374 = vmatpush1.bf16.msra.mxu0 %v2519_v40  ;;  %1538 = vmatpush1.bf16.msra.mxu1 %v2522_v41  ;;  %v2600_v40 = vld [vmem:[#allocation7 + $0xe8] sm:$0xff]  }
  0xd6   :  { %1375 = vmatprep.subr.bf16.mxu0 %v2527_v42  ;;  %1539 = vmatprep.subr.bf16.mxu1 %v2530_v43  ;;  %v2601_v41 = vld [vmem:[#allocation7 + $0x28] sm:$0xff]   ;;  %v2603_v43 = vld [vmem:[#allocation7 + $0x70] sm:$0xff]  }
  0xd7   :  { %v2602_v42 = vld [vmem:[#allocation7 + $0xa8] sm:$0xff]  }
  0xd9   :  { %1376 = vmatpush1.bf16.msra.mxu0 %v2525_v44  ;;  %1540 = vmatpush1.bf16.msra.mxu1 %v2528_v45  ;;  %v2604_v44 = vld [vmem:[#allocation7 + $0xf0] sm:$0xff]  }
  0xda   :  { %1377 = vmatprep.subr.bf16.mxu0 %v2533_v46  ;;  %1541 = vmatprep.subr.bf16.mxu1 %v2536_v47  ;;  %v2605_v45 = vld [vmem:[#allocation7 + $0x30] sm:$0xff]   ;;  %v2607_v47 = vld [vmem:[#allocation7 + $0x78] sm:$0xff]  }
  0xdb   :  { %v2606_v46 = vld [vmem:[#allocation7 + $0xb0] sm:$0xff]  }
  0xdd   :  { %1378 = vmatpush1.bf16.msra.mxu0 %v2531_v48  ;;  %1542 = vmatpush1.bf16.msra.mxu1 %v2534_v49  ;;  %v2608_v48 = vld [vmem:[#allocation7 + $0xf8] sm:$0xff]  }
  0xde   :  { %1379 = vmatprep.subr.bf16.mxu0 %v2539_v50  ;;  %1543 = vmatprep.subr.bf16.mxu1 %v2542_v51  ;;  %v2609_v49 = vld [vmem:[#allocation7 + $0x38] sm:$0xff]   ;;  %v273_v51 = vlaneseq }
  0xdf   :  { %v2610_v50 = vld [vmem:[#allocation7 + $0xb8] sm:$0xff]  }
  0xe1   :  { %1380 = vmatpush1.bf16.msra.mxu0 %v2537_v52  ;;  %1544 = vmatpush1.bf16.msra.mxu1 %v2540_v53  ;;  %v274_v52 = vshrl.u32 %v273_v51, 7 }
  0xe2   :  { %1381 = vmatprep.subr.bf16.mxu0 %v2545_v54  ;;  %1545 = vmatprep.subr.bf16.mxu1 %v2548_v55  ;;  %v271_v55 = vld [vmem:[%s2800_s2] sm:$0xf] }
  0xe3   :  { %v275_v53 = vsub.s32 0, %v274_v52  ;;  %v283_v54 = vsub.s32 2, %v274_v52 }
  0xe5   :  { %1382 = vmatpush1.bf16.msra.mxu0 %v2543_v56  ;;  %1546 = vmatpush1.bf16.msra.mxu1 %v2546_v57  ;;  %v279_v56 = vsub.s32 1, %v274_v52  ;;  %v287_v57 = vsub.s32 3, %v274_v52 }
  0xe6   :  { %1383 = vmatprep.subr.bf16.mxu0 %v2551_v58  ;;  %1547 = vmatprep.subr.bf16.mxu1 %v2554_v59  ;;  %v276_v58 = vrot.slane %v271_v55, %v275_v53  ;;  %v284_v59 = vrot.slane %v271_v55, %v283_v54 }
  0xe9   :  { %1384 = vmatpush1.bf16.msra.mxu0 %v2549_v60  ;;  %1548 = vmatpush1.bf16.msra.mxu1 %v2552_v61  ;;  %v280_v60 = vrot.slane %v271_v55, %v279_v56  ;;  %v288_v61 = vrot.slane %v271_v55, %v287_v57 }
  0xea   :  { %1385 = vmatprep.subr.bf16.mxu0 %v2557_v62  ;;  %1549 = vmatprep.subr.bf16.mxu1 %v2560_v63 }
  0xed   :  { %1386 = vmatpush1.bf16.msra.mxu0 %v2555_v0  ;;  %1550 = vmatpush1.bf16.msra.mxu1 %v2558_v1 }
  0xee   :  { %1387 = vmatprep.subr.bf16.mxu0 %v2563_v2  ;;  %1551 = vmatprep.subr.bf16.mxu1 %v2566_v3 }
  0xf1   :  { %1388 = vmatpush1.bf16.msra.mxu0 %v2561_v4  ;;  %1552 = vmatpush1.bf16.msra.mxu1 %v2564_v5 }
  0xf2   :  { %1389 = vmatprep.subr.bf16.mxu0 %v2569_v6  ;;  %1553 = vmatprep.subr.bf16.mxu1 %v2572_v7 }
  0xf5   :  { %1390 = vmatpush1.bf16.msra.mxu0 %v2567_v8  ;;  %1554 = vmatpush1.bf16.msra.mxu1 %v2570_v9 }
  0xf6   :  { %1400 = vmatprep.subr.bf16.mxu0 %v2575_v11  ;;  %1564 = vmatprep.subr.bf16.mxu1 %v2578_v12 }
  0xf8   :  { %1392 = vmatmul.mubr.bf16.vlgmr.msra.gmra.mrb[0].mxu0 %v72_v13  ;;  %1556 = vmatmul.mubr.bf16.vlgmr.msra.gmra.mrb[0].mxu1 %v72_v13 }
  0xf9   :  { %1401 = vmatpush1.bf16.msra.mxu0 %v2573_v14  ;;  %1565 = vmatpush1.bf16.msra.mxu1 %v2576_v15 }
  0xfa   :  { %1432 = vmatprep.mubr.bf16.mxu0 %v2712_v18  ;;  %1596 = vmatprep.mubr.bf16.mxu1 %v2712_v18 }
  0xfb   :  { %2204 = vmatprep.subr.bf16.mxu0 %v2579_v16  ;;  %2226 = vmatprep.subr.bf16.mxu1 %v2580_v17 }
 0x104   :  { %2169 = vmatmul.mubr.msk.bf16.vlgmr.msra.gmra.mrb[0].mxu0 %vm1273_vm0, %v74_v20  ;;  %2170 = vmatmul.mubr.msk.bf16.vlgmr.msra.gmra.mrb[0].mxu1 %vm1273_vm0, %v74_v20  ;;  %v2171_v20 = vld [vmem:[%s2802_s4] ss:$0 sm:$0xff] }
 0x105   :  { %2205 = vmatpush3.bf16.msra.mxu0 %v2581_v21  ;;  %2227 = vmatpush3.bf16.msra.mxu1 %v2582_v22 }
 0x106   :  { %2206 = vmatprep.subr.bf16.mxu0 %v2583_v23  ;;  %2228 = vmatprep.subr.bf16.mxu1 %v2584_v24 }
 0x109   :  { %2207 = vmatpush3.bf16.msra.mxu0 %v2585_v25  ;;  %2229 = vmatpush3.bf16.msra.mxu1 %v2586_v26 }
 0x10a   :  { %2208 = vmatprep.subr.bf16.mxu0 %v2587_v27  ;;  %2230 = vmatprep.subr.bf16.mxu1 %v2588_v28 }
 0x10d   :  { %2209 = vmatpush3.bf16.msra.mxu0 %v2589_v29  ;;  %2231 = vmatpush3.bf16.msra.mxu1 %v2590_v30 }
 0x10e   :  { %2210 = vmatprep.subr.bf16.mxu0 %v2591_v31  ;;  %2232 = vmatprep.subr.bf16.mxu1 %v2592_v32 }
 0x111   :  { %2211 = vmatpush3.bf16.msra.mxu0 %v2593_v33  ;;  %2233 = vmatpush3.bf16.msra.mxu1 %v2594_v34 }
 0x112   :  { %2212 = vmatprep.subr.bf16.mxu0 %v2595_v35  ;;  %2234 = vmatprep.subr.bf16.mxu1 %v2596_v36 }
 0x115   :  { %2213 = vmatpush3.bf16.msra.mxu0 %v2597_v37  ;;  %2235 = vmatpush3.bf16.msra.mxu1 %v2598_v38 }
 0x116   :  { %2214 = vmatprep.subr.bf16.mxu0 %v2599_v39  ;;  %2236 = vmatprep.subr.bf16.mxu1 %v2600_v40 }
 0x119   :  { %2215 = vmatpush3.bf16.msra.mxu0 %v2601_v41  ;;  %2237 = vmatpush3.bf16.msra.mxu1 %v2602_v42 }
 0x11a   :  { %2216 = vmatprep.subr.bf16.mxu0 %v2603_v43  ;;  %2238 = vmatprep.subr.bf16.mxu1 %v2604_v44 }
 0x11d   :  { %2217 = vmatpush3.bf16.msra.mxu0 %v2605_v45  ;;  %2239 = vmatpush3.bf16.msra.mxu1 %v2606_v46 }
 0x11e   :  { %2218 = vmatprep.subr.bf16.mxu0 %v2607_v47  ;;  %2240 = vmatprep.subr.bf16.mxu1 %v2608_v48 }
 0x121   :  { %2219 = vmatpush3.bf16.msra.mxu0 %v2609_v49  ;;  %2241 = vmatpush3.bf16.msra.mxu1 %v2610_v50 }
 0x1d7   :  { %v1434_v62 = vpop.f32.mrb[0].mxu0  ;;  %v1598_v63 = vpop.f32.mrb[0].mxu1 }
 0x1d8   :  { %v2248_v0 = vadd.f32 %v1434_v62, %v276_v58  ;;  %v2250_v1 = vadd.f32 %v1598_v63, %v284_v59  ;;  %v1436_v2 = vpop.f32.mrb[1].mxu0  ;;  %v1600_v3 = vpop.f32.mrb[1].mxu1 }
 0x1d9   :  { %v2249_v4 = vadd.f32 %v1436_v2, %v280_v60  ;;  %v2251_v5 = vadd.f32 %v1600_v3, %v288_v61  ;;  %v1438_v6 = vpop.f32.mrb[2].mxu0  ;;  %v1602_v7 = vpop.f32.mrb[2].mxu1 }
 0x1da   :  { %v1605_v8 = vmax.f32 %v2248_v0, 0.0  ;;  %v1607_v9 = vmax.f32 %v2250_v1, 0.0  ;;  %v1439_v10 = vpop.f32.mrb[3].mxu0  ;;  %v1603_v11 = vpop.f32.mrb[3].mxu1 }
 0x1db   :  { %v1606_v12 = vmax.f32 %v2249_v4, 0.0  ;;  %v1608_v13 = vmax.f32 %v2251_v5, 0.0 }
 0x1dc   :  { %v1609_v16 = vpack.c.bf16 %v1605_v8, %v1605_v8  ;;  %v1611_v17 = vpack.c.bf16 %v1607_v9, %v1607_v9 }
 0x1dd   :  { %v1610_v14 = vpack.c.bf16 %v1606_v12, %v1606_v12  ;;  %v1612_v15 = vpack.c.bf16 %v1608_v13, %v1608_v13 }
 0x1df   :  { %1908 = vmatprep.mubr.bf16.mxu0 %v1610_v14  ;;  %1948 = vmatprep.mubr.bf16.mxu1 %v1612_v15 }
 0x1e0   :  { %1909 = vmatmul.mubr.bf16.vlgmr.msra.gmra.mrb[4].mxu0 %v1609_v16  ;;  %1949 = vmatmul.mubr.bf16.vlgmr.msra.gmra.mrb[4].mxu1 %v1611_v17 }
 0x2b3   :  { %v2220_v18 = vpop.f32.mrb[4].mxu0  ;;  %v2242_v19 = vpop.f32.mrb[4].mxu1 }
 0x2b4   :  { %v2221_v21 = vpop.f32.mrb[5].mxu0  ;;  %v2243_v22 = vpop.f32.mrb[5].mxu1 }
 0x2b5   :  { %v2222_v23 = vadd.f32 %v2221_v21, %v2220_v18  ;;  %v2244_v24 = vadd.f32 %v2243_v22, %v2242_v19  ;;  %v2223_v25 = vpop.f32.mrb[6].mxu0  ;;  %v2245_v26 = vpop.f32.mrb[6].mxu1 }
 0x2b6   :  { %v2224_v27 = vpop.f32.mrb[7].mxu0  ;;  %v2246_v28 = vpop.f32.mrb[7].mxu1 }
 0x2b7   :  { %v1911_v29 = vadd.f32 %v2222_v23, %v2171_v20 }
 0x2b9   :  { %v1951_v30 = vadd.f32 %v2244_v24, %v1911_v29 }
 0x2bb   :  { %1956 = vst [vmem:[#allocation8] sm:$0xff] %v1951_v30 }
 0x2bc   :  { %2688 = shalt.err (!%p2685_p0)
}
 0x2bd   :  { %s2689_s12 = scalar_lea.hbm %s2803_s5, 128 }
 0x2be   :  { %p2690_p1 = scmp.ne.s32.totalorder %s2803_s5, %s2689_s12  ;;  %p2693_p2 = scmp.lt.u32.totalorder %s2689_s12, %s2803_s5 }
 0x2c0   :  { %p2695_p3 = pnand %p2693_p2, %p2690_p1 }
 0x2c2   :  { %2698 = shalt.err (!%p2695_p3)
}
 0x2c3   :  { %1966 = dma.vmem_to_hbm [thread:$0]  %s1964_s9, 128, %s2803_s5, [#allocation4]  }
 0x2c4   :  { %2703 = dma.done.wait [#allocation4], 128  }
 0x2c5   :  { %2704 = vsyncadd [#allocation4], 4294967168 }
 0x2c6   :  { %1970 = vsyncpa [#allocation3], 1 }
 0x2c7   :  { %1971 = vsyncpa [#allocation6], 1 }
 0x2c8   :  { %1972 = vsyncpa [#allocation4], 1 }

</bundles_post_ra>
